<compile_context>
chip_gen: v7x
topology: tpu7x:2x2x1
jax: 0.10.0
libtpu: 0.0.40
codegen_flags: <defaults>
</compile_context>

<pallas_src>
import functools
import math

import jax
import jax.numpy as jnp
from jax.experimental import pallas as pl
from jax.experimental.pallas import tpu as pltpu

_DEG2RAD = math.pi / 180.0
_RAD2DEG = 180.0 / math.pi
_HALF_PI = math.pi / 2.0
_PI = math.pi

_N1_PAD = 256      # hl1 width: 200 -> 256 (lane multiple)
_N2_PAD = 128      # hl2 width: 100 -> 128
_OUT_PAD = 128     # lane-dense output slab width

_VMEM = pl.BlockSpec(memory_space=pltpu.MemorySpace.VMEM)


# ---------------------------------------------------------------------------
# Mosaic-safe elementwise helpers (avoid lax.atan2_p / lax.rem_p lowering).
# ---------------------------------------------------------------------------
def _relu(x):
    return jnp.maximum(x, 0.0)


def _atan_unit(z):
    """atan(z) for z in [0, 1]: two argument halvings + 9th-order odd Taylor.

    Max abs error ~1e-8 (well below f32 epsilon); uses only sqrt/div/mul/add.
    """
    z1 = z / (1.0 + jnp.sqrt(1.0 + z * z))
    z2 = z1 / (1.0 + jnp.sqrt(1.0 + z1 * z1))
    s = z2 * z2
    p = z2 * (1.0 + s * (-1.0 / 3.0 + s * (1.0 / 5.0
                         + s * (-1.0 / 7.0 + s * (1.0 / 9.0)))))
    return 4.0 * p


def _atan2(y, x):
    """Full-quadrant atan2(y, x) (torch.atan2 convention) from safe ops."""
    ax = jnp.abs(x)
    ay = jnp.abs(y)
    hi = jnp.maximum(ax, ay)
    lo = jnp.minimum(ax, ay)
    t = lo / jnp.where(hi > 0.0, hi, 1.0)
    a = _atan_unit(t)
    a = jnp.where(ay > ax, _HALF_PI - a, a)
    a = jnp.where(x < 0.0, _PI - a, a)
    return jnp.where(y < 0.0, -a, a)


def _floor_mod(v, m):
    """torch.remainder semantics for a positive scalar modulus m."""
    return v - jnp.floor(v / m) * m


# ---------------------------------------------------------------------------
# Actor kernel:  lin -> relu -> GRU -> relu -> hl1 -> relu -> hl2 -> relu
#                -> actor -> tanh
# ---------------------------------------------------------------------------
def _actor_kernel(B, T, ad_ref, lin_ref, gru_i_ref, gru_h_ref,
                  hl1_ref, hl2_ref, act_ref, out_ref):
    ad = ad_ref[...]                            # (B*T, 2) = [angle, distance]
    dl = lin_ref.shape[1]
    dr = gru_i_ref.shape[1] // 3
    k1 = hl1_ref.shape[1]                       # padded hl1 width (256)
    k2 = hl2_ref.shape[1]                       # padded hl2 width (128)

    # lin (state_space == 2): cat + matmul expressed as broadcast multiplies.
    w_lin0 = lin_ref[0:1, :]
    w_lin1 = lin_ref[1:2, :]
    b_lin = lin_ref[2:3, :]
    x1 = _relu(ad[:, 0:1] * (1.0 / 180.0) * w_lin0
               + ad[:, 1:2] * (1.0 / 400.0) * w_lin1
               + b_lin)                         # (B*T, dl)

    # GRU: fused-gate weights; input projection hoisted out of the recurrence.
    w_ih = gru_i_ref[0:dl, :]
    b_ih = gru_i_ref[dl:dl + 1, :]
    w_hh = gru_h_ref[0:dr, :]
    b_hh = gru_h_ref[dr:dr + 1, :]
    gi_all = jnp.dot(x1, w_ih, preferred_element_type=jnp.float32) + b_ih

    # Recurrence over the B axis (T is the GRU batch), h0 = 0.
    h = jnp.zeros((T, dr), jnp.float32)
    outs = []
    for b in range(B):                          # static unroll, B is tiny
        gi = gi_all[b * T:(b + 1) * T, :]       # (T, 3*dr)
        gh = jnp.dot(h, w_hh, preferred_element_type=jnp.float32) + b_hh
        r = jax.nn.sigmoid(gi[:, 0:dr] + gh[:, 0:dr])
        z = jax.nn.sigmoid(gi[:, dr:2 * dr] + gh[:, dr:2 * dr])
        n = jnp.tanh(gi[:, 2 * dr:3 * dr] + r * gh[:, 2 * dr:3 * dr])
        h = (1.0 - z) * n + z * h               # (T, dr)
        outs.append(h)
    x2 = _relu(jnp.concatenate(outs, axis=0))          # (B*T, dr)

    # MLP head (widths zero-padded to 256 / 128; padding is numerically exact).
    x3 = _relu(jnp.dot(x2, hl1_ref[0:dr, :],
                       preferred_element_type=jnp.float32)
               + hl1_ref[dr:dr + 1, :])                # (B*T, 256)
    x4 = _relu(jnp.dot(x3, hl2_ref[0:k1, :],
                       preferred_element_type=jnp.float32)
               + hl2_ref[k1:k1 + 1, :])                # (B*T, 128)
    out_ref[...] = jnp.tanh(jnp.dot(x4, act_ref[0:k2, :],
                                    preferred_element_type=jnp.float32)
                            + act_ref[k2:k2 + 1, :])   # (B*T, 128) lane-dense


# ---------------------------------------------------------------------------
# Critic kernel:  get_next_ad (elementwise trig) -> lin -> relu -> hl1 -> relu
#                 -> hl2 -> relu -> critic
# ---------------------------------------------------------------------------
def _critic_kernel(packed_ref, lin_ref, hl1_ref, hl2_ref, cr_ref, out_ref):
    p = packed_ref[...]                # (B*T, 8): yaw, x, y, a0, a1, angle, dist, 0
    yaw = p[:, 0:1]
    x = p[:, 1:2]
    y = p[:, 2:3]
    a0 = p[:, 3:4]
    a1 = p[:, 4:5]
    angle = p[:, 5:6]
    dist = p[:, 6:7]

    # ---- get_next_ad ----
    yaw_new = yaw + a0 * 8.0
    fwd_x = jnp.cos(yaw_new * _DEG2RAD)
    fwd_y = jnp.sin(yaw_new * _DEG2RAD)
    x_new = x + a1 * 8.0 * fwd_x
    y_new = y + a1 * 8.0 * fwd_y
    ytt = _floor_mod(yaw - angle + 180.0, 360.0) - 180.0
    target_x = x + dist * jnp.cos(ytt * _DEG2RAD)
    target_y = y + dist * jnp.sin(ytt * _DEG2RAD)
    ndx = target_x - x_new
    ndy = target_y - y_new
    d_next = jnp.sqrt(ndx * ndx + ndy * ndy)
    # Guard the degenerate d_next == 0 case (PyTorch reference would emit NaN).
    safe_d = jnp.where(d_next > 0.0, d_next, 1.0)
    a_next = (_atan2(ndx / safe_d, ndy / safe_d)
              - _atan2(fwd_x, fwd_y)) * _RAD2DEG
    a_next = _floor_mod(a_next + 180.0, 360.0) - 180.0

    # ---- critic MLP ----
    dl = lin_ref.shape[1]
    k1 = hl1_ref.shape[1]
    k2 = hl2_ref.shape[1]
    w_lin0 = lin_ref[0:1, :]
    w_lin1 = lin_ref[1:2, :]
    b_lin = lin_ref[2:3, :]
    x1 = _relu(a_next * (1.0 / 180.0) * w_lin0
               + d_next * (1.0 / 400.0) * w_lin1
               + b_lin)                                # (B*T, dl)
    q = _relu(jnp.dot(x1, hl1_ref[0:dl, :],
                      preferred_element_type=jnp.float32)
              + hl1_ref[dl:dl + 1, :])                 # (B*T, 256)
    q = _relu(jnp.dot(q, hl2_ref[0:k1, :],
                      preferred_element_type=jnp.float32)
              + hl2_ref[k1:k1 + 1, :])                 # (B*T, 128)
    out_ref[...] = (jnp.dot(q, cr_ref[0:k2, :],
                            preferred_element_type=jnp.float32)
                    + cr_ref[k2:k2 + 1, :])            # (B*T, 128), col 0 valid


# ---------------------------------------------------------------------------
# Wrappers (everything fits in VMEM; single invocation, no grid).
# ---------------------------------------------------------------------------
def actor_forward(pp, angle, distance):
    B, T, _ = angle.shape
    bt = B * T
    oa = pp['oa']
    ad = jnp.concatenate([angle, distance], axis=-1).reshape(bt, 2)
    args = (ad, pp['lin'], pp['gru_i'], pp['gru_h'],
            pp['hl1'], pp['hl2'], pp['act'])

    dl = pp['lin'].shape[1]
    dr3 = pp['gru_i'].shape[1]
    dr = dr3 // 3
    flops = (2 * bt * dl * dr3 + 2 * B * T * dr * dr3
             + 2 * bt * dr * _N1_PAD + 2 * bt * _N1_PAD * _N2_PAD
             + 2 * bt * _N2_PAD * _OUT_PAD)
    transcendentals = B * T * dr * 3 + bt * _OUT_PAD
    nbytes = 4 * (sum(int(a.size) for a in args) + bt * _OUT_PAD)

    out = pl.pallas_call(
        functools.partial(_actor_kernel, B, T),
        out_shape=jax.ShapeDtypeStruct((bt, _OUT_PAD), jnp.float32),
        in_specs=[_VMEM] * len(args),
        out_specs=_VMEM,
        cost_estimate=pl.CostEstimate(flops=flops,
                                      transcendentals=transcendentals,
                                      bytes_accessed=nbytes),
    )(*args)
    return out[:, :oa].reshape(B, T, oa)


def critic_forward(pp, yaw, x, y, a0, a1, angle, distance):
    B, T, _ = yaw.shape
    bt = B * T
    packed = jnp.concatenate(
        [yaw, x, y, a0, a1, angle, distance, jnp.zeros_like(yaw)],
        axis=-1).reshape(bt, 8)
    args = (packed, pp['lin'], pp['hl1'], pp['hl2'], pp['cr'])

    dl = pp['lin'].shape[1]
    flops = (2 * bt * dl * _N1_PAD + 2 * bt * _N1_PAD * _N2_PAD
             + 2 * bt * _N2_PAD * _OUT_PAD)
    transcendentals = bt * 16          # cos/sin/sqrt/atan chain
    nbytes = 4 * (sum(int(a.size) for a in args) + bt * _OUT_PAD)

    out = pl.pallas_call(
        _critic_kernel,
        out_shape=jax.ShapeDtypeStruct((bt, _OUT_PAD), jnp.float32),
        in_specs=[_VMEM] * len(args),
        out_specs=_VMEM,
        cost_estimate=pl.CostEstimate(flops=flops,
                                      transcendentals=transcendentals,
                                      bytes_accessed=nbytes),
    )(*args)
    return out[:, :1].reshape(B, T, 1)


def ddpg_net_forward(packed_params, input_data):
    """Mirrors DDPG_Net.forward: actor if no 'action' given, else critic."""
    if input_data.get('action', None) is None:
        return actor_forward(packed_params['actor'],
                             input_data['angle'], input_data['distance'])
    a = input_data['action']
    return critic_forward(packed_params['critic'],
                          input_data['yaw'], input_data['x'], input_data['y'],
                          a[:, :, 0:1], a[:, :, 1:2],
                          input_data['angle'],
                          input_data['distance'][:, :, 0:1])


# ---------------------------------------------------------------------------
# Parameter init (PyTorch-style uniform bounds) and packing/padding.
# ---------------------------------------------------------------------------
def _linear(key, fan_in, fan_out):
    k1, k2 = jax.random.split(key)
    bound = 1.0 / math.sqrt(fan_in)
    w = jax.random.uniform(k1, (fan_in, fan_out), jnp.float32, -bound, bound)
    b = jax.random.uniform(k2, (1, fan_out), jnp.float32, -bound, bound)
    return w, b


def _ceil8(n):
    return ((n + 7) // 8) * 8


def _pad2(a, rows, cols):
    return jnp.pad(a, ((0, rows - a.shape[0]), (0, cols - a.shape[1])))


def _pack_layer(w, b, k_pad, n_pad):
    """Zero-pad W to (k_pad, n_pad), append bias as one extra row, pad rows to 8x."""
    w = _pad2(w, k_pad, n_pad)
    b = _pad2(b, 1, n_pad)
    return _pad2(jnp.concatenate([w, b], axis=0), _ceil8(k_pad + 1), n_pad)


def init_params(key, settings):
    dl, dr, oa = settings['dl'], settings['dr'], settings['output_a']
    ks = jax.random.split(key, 10)

    # --- actor ---
    w_lin, b_lin = _linear(ks[0], 2, dl)
    w_ih, b_ih = _linear(ks[1], dl, 3 * dr)      # GRU input weights (r|z|n)
    w_hh, b_hh = _linear(ks[2], dr, 3 * dr)      # GRU hidden weights (r|z|n)
    w_hl1, b_hl1 = _linear(ks[3], dr, 200)
    w_hl2, b_hl2 = _linear(ks[4], 200, 100)
    w_act, b_act = _linear(ks[5], 100, oa)
    actor = {'w_lin': w_lin, 'b_lin': b_lin,
             'w_ih': w_ih, 'b_ih': b_ih, 'w_hh': w_hh, 'b_hh': b_hh,
             'w_hl1': w_hl1, 'b_hl1': b_hl1,
             'w_hl2': w_hl2, 'b_hl2': b_hl2,
             'w_act': w_act, 'b_act': b_act}

    # --- critic ---
    cw_lin, cb_lin = _linear(ks[6], 2, dl)
    cw_hl1, cb_hl1 = _linear(ks[7], dr, 200)
    cw_hl2, cb_hl2 = _linear(ks[8], 200, 100)
    cw_cr, cb_cr = _linear(ks[9], 100, 1)
    critic = {'w_lin': cw_lin, 'b_lin': cb_lin,
              'w_hl1': cw_hl1, 'b_hl1': cb_hl1,
              'w_hl2': cw_hl2, 'b_hl2': cb_hl2,
              'w_cr': cw_cr, 'b_cr': cb_cr}
    return {'actor': actor, 'critic': critic}


def pack_actor_params(p):
    dl = p['w_lin'].shape[1]
    dr = p['w_hh'].shape[0]
    return {
        'lin': _pack_layer(p['w_lin'], p['b_lin'], p['w_lin'].shape[0], dl),
        'gru_i': _pack_layer(p['w_ih'], p['b_ih'], dl, 3 * dr),
        'gru_h': _pack_layer(p['w_hh'], p['b_hh'], dr, 3 * dr),
        'hl1': _pack_layer(p['w_hl1'], p['b_hl1'], dr, _N1_PAD),
        'hl2': _pack_layer(p['w_hl2'], p['b_hl2'], _N1_PAD, _N2_PAD),
        'act': _pack_layer(p['w_act'], p['b_act'], _N2_PAD, _OUT_PAD),
        'oa': int(p['w_act'].shape[1]),
    }


def pack_critic_params(p):
    dl = p['w_lin'].shape[1]
    return {
        'lin': _pack_layer(p['w_lin'], p['b_lin'], p['w_lin'].shape[0], dl),
        'hl1': _pack_layer(p['w_hl1'], p['b_hl1'], p['w_hl1'].shape[0], _N1_PAD),
        'hl2': _pack_layer(p['w_hl2'], p['b_hl2'], _N1_PAD, _N2_PAD),
        'cr': _pack_layer(p['w_cr'], p['b_cr'], _N2_PAD, _OUT_PAD),
    }


def pack_params(params):
    return {'actor': pack_actor_params(params['actor']),
            'critic': pack_critic_params(params['critic'])}


if __name__ == "__main__":
    settings = {'state_space': 2, 'dl': 32, 'dr': 32, 'output_a': 2, 'TD3': False}
    B, T = 2, 8

    key = jax.random.PRNGKey(0)
    kp, k1, k2, k3, k4, k5, k6 = jax.random.split(key, 7)
    params = init_params(kp, settings)
    packed = pack_params(params)

    angle = jax.random.uniform(k1, (B, T, 1), jnp.float32, -180.0, 180.0)
    distance = jax.random.uniform(k2, (B, T, 1), jnp.float32, 1.0, 400.0)
    yaw = jax.random.uniform(k3, (B, T, 1), jnp.float32, -180.0, 180.0)
    xpos = jax.random.uniform(k4, (B, T, 1), jnp.float32, -50.0, 50.0)
    ypos = jax.random.uniform(k5, (B, T, 1), jnp.float32, -50.0, 50.0)
    action = jax.random.uniform(k6, (B, T, 2), jnp.float32, -1.0, 1.0)
    hc = jnp.zeros((1, B * T, settings['dl']), jnp.float32)  # API parity (unused by forward)

    # Actor path (no 'action' in the input dict).
    actor_in = {'angle': angle, 'distance': distance, 'hc': hc}
    act_out = jax.block_until_ready(ddpg_net_forward(packed, actor_in))
    assert act_out.shape == (B, T, settings['output_a'])
    assert bool(jnp.all(jnp.isfinite(act_out)))
    assert bool(jnp.all(jnp.abs(act_out) <= 1.0))

    # Critic path ('action' present).
    critic_in = {'angle': angle, 'distance': distance, 'yaw': yaw,
                 'x': xpos, 'y': ypos, 'action': action}
    q_out = jax.block_until_ready(ddpg_net_forward(packed, critic_in))
    assert q_out.shape == (B, T, 1)
    assert bool(jnp.all(jnp.isfinite(q_out)))

    print("KERNEL_OK")
</pallas_src>

<mosaic_0001>
module attributes {stable_mosaic.version = 11 : i64} {
  func.func @_actor_kernel(%arg0: memref<16x2xf32, #tpu.memory_space<vmem>>, %arg1: memref<8x32xf32, #tpu.memory_space<vmem>>, %arg2: memref<40x96xf32, #tpu.memory_space<vmem>>, %arg3: memref<40x96xf32, #tpu.memory_space<vmem>>, %arg4: memref<40x256xf32, #tpu.memory_space<vmem>>, %arg5: memref<264x128xf32, #tpu.memory_space<vmem>>, %arg6: memref<136x128xf32, #tpu.memory_space<vmem>>, %arg7: memref<16x128xf32, #tpu.memory_space<vmem>>) attributes {dimension_semantics = [], scalar_prefetch = 0 : i64, scratch_operands = 0 : i64, tpu.core_type = #tpu.core_type<tc>} {
    %c0 = arith.constant 0 : index
    %c0_0 = arith.constant 0 : index
    %0 = vector.load %arg0[%c0, %c0_0] : memref<16x2xf32, #tpu.memory_space<vmem>>, vector<16x2xf32>
    %c0_1 = arith.constant 0 : index
    %c0_2 = arith.constant 0 : index
    %1 = vector.load %arg1[%c0_1, %c0_2] : memref<8x32xf32, #tpu.memory_space<vmem>>, vector<1x32xf32>
    %c1 = arith.constant 1 : index
    %c0_3 = arith.constant 0 : index
    %2 = vector.load %arg1[%c1, %c0_3] : memref<8x32xf32, #tpu.memory_space<vmem>>, vector<1x32xf32>
    %c2 = arith.constant 2 : index
    %c0_4 = arith.constant 0 : index
    %3 = vector.load %arg1[%c2, %c0_4] : memref<8x32xf32, #tpu.memory_space<vmem>>, vector<1x32xf32>
    %4 = vector.extract_strided_slice %0 {offsets = [0, 0], sizes = [16, 1], strides = [1, 1]} : vector<16x2xf32> to vector<16x1xf32>
    %cst = arith.constant 0.00555555569 : f32
    %5 = vector.broadcast %cst : f32 to vector<16x1xf32>
    %6 = arith.mulf %4, %5 : vector<16x1xf32>
    %7 = vector.broadcast %6 : vector<16x1xf32> to vector<16x32xf32>
    %8 = vector.broadcast %1 : vector<1x32xf32> to vector<16x32xf32>
    %9 = arith.mulf %7, %8 : vector<16x32xf32>
    %10 = vector.extract_strided_slice %0 {offsets = [0, 1], sizes = [16, 1], strides = [1, 1]} : vector<16x2xf32> to vector<16x1xf32>
    %cst_5 = arith.constant 2.500000e-03 : f32
    %11 = vector.broadcast %cst_5 : f32 to vector<16x1xf32>
    %12 = arith.mulf %10, %11 : vector<16x1xf32>
    %13 = vector.broadcast %12 : vector<16x1xf32> to vector<16x32xf32>
    %14 = vector.broadcast %2 : vector<1x32xf32> to vector<16x32xf32>
    %15 = arith.mulf %13, %14 : vector<16x32xf32>
    %16 = arith.addf %9, %15 : vector<16x32xf32>
    %17 = vector.broadcast %3 : vector<1x32xf32> to vector<16x32xf32>
    %18 = arith.addf %16, %17 : vector<16x32xf32>
    %cst_6 = arith.constant 0.000000e+00 : f32
    %19 = vector.broadcast %cst_6 : f32 to vector<16x32xf32>
    %20 = arith.maximumf %18, %19 : vector<16x32xf32>
    %c0_7 = arith.constant 0 : index
    %c0_8 = arith.constant 0 : index
    %21 = vector.load %arg2[%c0_7, %c0_8] : memref<40x96xf32, #tpu.memory_space<vmem>>, vector<32x96xf32>
    %c32 = arith.constant 32 : index
    %c0_9 = arith.constant 0 : index
    %22 = vector.load %arg2[%c32, %c0_9] : memref<40x96xf32, #tpu.memory_space<vmem>>, vector<1x96xf32>
    %c0_10 = arith.constant 0 : index
    %c0_11 = arith.constant 0 : index
    %23 = vector.load %arg3[%c0_10, %c0_11] : memref<40x96xf32, #tpu.memory_space<vmem>>, vector<32x96xf32>
    %c32_12 = arith.constant 32 : index
    %c0_13 = arith.constant 0 : index
    %24 = vector.load %arg3[%c32_12, %c0_13] : memref<40x96xf32, #tpu.memory_space<vmem>>, vector<1x96xf32>
    %cst_14 = arith.constant dense<0.000000e+00> : vector<16x96xf32>
    %25 = tpu.matmul %20, %21, %cst_14 {dimension_numbers = #tpu.dot_dimension_numbers<[1], [0], [0], [1], [0, 0, 1, 1], [], []>} : vector<16x32xf32>, vector<32x96xf32>, vector<16x96xf32> -> vector<16x96xf32>
    %26 = vector.broadcast %22 : vector<1x96xf32> to vector<16x96xf32>
    %27 = arith.addf %25, %26 : vector<16x96xf32>
    %cst_15 = arith.constant 0.000000e+00 : f32
    %28 = vector.broadcast %cst_15 : f32 to vector<8x32xf32>
    %29 = vector.extract_strided_slice %27 {offsets = [0, 0], sizes = [8, 96], strides = [1, 1]} : vector<16x96xf32> to vector<8x96xf32>
    %cst_16 = arith.constant dense<0.000000e+00> : vector<8x96xf32>
    %30 = tpu.matmul %28, %23, %cst_16 {dimension_numbers = #tpu.dot_dimension_numbers<[1], [0], [0], [1], [0, 0, 1, 1], [], []>} : vector<8x32xf32>, vector<32x96xf32>, vector<8x96xf32> -> vector<8x96xf32>
    %31 = vector.broadcast %24 : vector<1x96xf32> to vector<8x96xf32>
    %32 = arith.addf %30, %31 : vector<8x96xf32>
    %33 = vector.extract_strided_slice %29 {offsets = [0, 0], sizes = [8, 32], strides = [1, 1]} : vector<8x96xf32> to vector<8x32xf32>
    %34 = vector.extract_strided_slice %32 {offsets = [0, 0], sizes = [8, 32], strides = [1, 1]} : vector<8x96xf32> to vector<8x32xf32>
    %35 = arith.addf %33, %34 : vector<8x32xf32>
    %36 = arith.negf %35 : vector<8x32xf32>
    %37 = math.exp %36 : vector<8x32xf32>
    %cst_17 = arith.constant 1.000000e+00 : f32
    %38 = vector.broadcast %cst_17 : f32 to vector<8x32xf32>
    %39 = arith.addf %38, %37 : vector<8x32xf32>
    %40 = arith.divf %38, %39 : vector<8x32xf32>
    %41 = vector.extract_strided_slice %29 {offsets = [0, 32], sizes = [8, 32], strides = [1, 1]} : vector<8x96xf32> to vector<8x32xf32>
    %42 = vector.extract_strided_slice %32 {offsets = [0, 32], sizes = [8, 32], strides = [1, 1]} : vector<8x96xf32> to vector<8x32xf32>
    %43 = arith.addf %41, %42 : vector<8x32xf32>
    %44 = arith.negf %43 : vector<8x32xf32>
    %45 = math.exp %44 : vector<8x32xf32>
    %cst_18 = arith.constant 1.000000e+00 : f32
    %46 = vector.broadcast %cst_18 : f32 to vector<8x32xf32>
    %47 = arith.addf %46, %45 : vector<8x32xf32>
    %48 = arith.divf %46, %47 : vector<8x32xf32>
    %49 = vector.extract_strided_slice %29 {offsets = [0, 64], sizes = [8, 32], strides = [1, 1]} : vector<8x96xf32> to vector<8x32xf32>
    %50 = vector.extract_strided_slice %32 {offsets = [0, 64], sizes = [8, 32], strides = [1, 1]} : vector<8x96xf32> to vector<8x32xf32>
    %51 = arith.mulf %40, %50 : vector<8x32xf32>
    %52 = arith.addf %49, %51 : vector<8x32xf32>
    %53 = math.tanh %52 : vector<8x32xf32>
    %cst_19 = arith.constant 1.000000e+00 : f32
    %54 = vector.broadcast %cst_19 : f32 to vector<8x32xf32>
    %55 = arith.subf %54, %48 : vector<8x32xf32>
    %56 = arith.mulf %55, %53 : vector<8x32xf32>
    %57 = arith.mulf %48, %28 : vector<8x32xf32>
    %58 = arith.addf %56, %57 : vector<8x32xf32>
    %59 = vector.extract_strided_slice %27 {offsets = [8, 0], sizes = [8, 96], strides = [1, 1]} : vector<16x96xf32> to vector<8x96xf32>
    %cst_20 = arith.constant dense<0.000000e+00> : vector<8x96xf32>
    %60 = tpu.matmul %58, %23, %cst_20 {dimension_numbers = #tpu.dot_dimension_numbers<[1], [0], [0], [1], [0, 0, 1, 1], [], []>} : vector<8x32xf32>, vector<32x96xf32>, vector<8x96xf32> -> vector<8x96xf32>
    %61 = vector.broadcast %24 : vector<1x96xf32> to vector<8x96xf32>
    %62 = arith.addf %60, %61 : vector<8x96xf32>
    %63 = vector.extract_strided_slice %59 {offsets = [0, 0], sizes = [8, 32], strides = [1, 1]} : vector<8x96xf32> to vector<8x32xf32>
    %64 = vector.extract_strided_slice %62 {offsets = [0, 0], sizes = [8, 32], strides = [1, 1]} : vector<8x96xf32> to vector<8x32xf32>
    %65 = arith.addf %63, %64 : vector<8x32xf32>
    %66 = arith.negf %65 : vector<8x32xf32>
    %67 = math.exp %66 : vector<8x32xf32>
    %cst_21 = arith.constant 1.000000e+00 : f32
    %68 = vector.broadcast %cst_21 : f32 to vector<8x32xf32>
    %69 = arith.addf %68, %67 : vector<8x32xf32>
    %70 = arith.divf %68, %69 : vector<8x32xf32>
    %71 = vector.extract_strided_slice %59 {offsets = [0, 32], sizes = [8, 32], strides = [1, 1]} : vector<8x96xf32> to vector<8x32xf32>
    %72 = vector.extract_strided_slice %62 {offsets = [0, 32], sizes = [8, 32], strides = [1, 1]} : vector<8x96xf32> to vector<8x32xf32>
    %73 = arith.addf %71, %72 : vector<8x32xf32>
    %74 = arith.negf %73 : vector<8x32xf32>
    %75 = math.exp %74 : vector<8x32xf32>
    %cst_22 = arith.constant 1.000000e+00 : f32
    %76 = vector.broadcast %cst_22 : f32 to vector<8x32xf32>
    %77 = arith.addf %76, %75 : vector<8x32xf32>
    %78 = arith.divf %76, %77 : vector<8x32xf32>
    %79 = vector.extract_strided_slice %59 {offsets = [0, 64], sizes = [8, 32], strides = [1, 1]} : vector<8x96xf32> to vector<8x32xf32>
    %80 = vector.extract_strided_slice %62 {offsets = [0, 64], sizes = [8, 32], strides = [1, 1]} : vector<8x96xf32> to vector<8x32xf32>
    %81 = arith.mulf %70, %80 : vector<8x32xf32>
    %82 = arith.addf %79, %81 : vector<8x32xf32>
    %83 = math.tanh %82 : vector<8x32xf32>
    %cst_23 = arith.constant 1.000000e+00 : f32
    %84 = vector.broadcast %cst_23 : f32 to vector<8x32xf32>
    %85 = arith.subf %84, %78 : vector<8x32xf32>
    %86 = arith.mulf %85, %83 : vector<8x32xf32>
    %87 = arith.mulf %78, %58 : vector<8x32xf32>
    %88 = arith.addf %86, %87 : vector<8x32xf32>
    %89 = tpu.concatenate %58, %88 in 0 : vector<8x32xf32>, vector<8x32xf32> -> vector<16x32xf32>
    %cst_24 = arith.constant 0.000000e+00 : f32
    %90 = vector.broadcast %cst_24 : f32 to vector<16x32xf32>
    %91 = arith.maximumf %89, %90 : vector<16x32xf32>
    %c0_25 = arith.constant 0 : index
    %c0_26 = arith.constant 0 : index
    %92 = vector.load %arg4[%c0_25, %c0_26] : memref<40x256xf32, #tpu.memory_space<vmem>>, vector<32x256xf32>
    %cst_27 = arith.constant dense<0.000000e+00> : vector<16x256xf32>
    %93 = tpu.matmul %91, %92, %cst_27 {dimension_numbers = #tpu.dot_dimension_numbers<[1], [0], [0], [1], [0, 0, 1, 1], [], []>} : vector<16x32xf32>, vector<32x256xf32>, vector<16x256xf32> -> vector<16x256xf32>
    %c32_28 = arith.constant 32 : index
    %c0_29 = arith.constant 0 : index
    %94 = vector.load %arg4[%c32_28, %c0_29] : memref<40x256xf32, #tpu.memory_space<vmem>>, vector<1x256xf32>
    %95 = vector.broadcast %94 : vector<1x256xf32> to vector<16x256xf32>
    %96 = arith.addf %93, %95 : vector<16x256xf32>
    %cst_30 = arith.constant 0.000000e+00 : f32
    %97 = vector.broadcast %cst_30 : f32 to vector<16x256xf32>
    %98 = arith.maximumf %96, %97 : vector<16x256xf32>
    %c0_31 = arith.constant 0 : index
    %c0_32 = arith.constant 0 : index
    %99 = vector.load %arg5[%c0_31, %c0_32] : memref<264x128xf32, #tpu.memory_space<vmem>>, vector<256x128xf32>
    %cst_33 = arith.constant dense<0.000000e+00> : vector<16x128xf32>
    %100 = tpu.matmul %98, %99, %cst_33 {dimension_numbers = #tpu.dot_dimension_numbers<[1], [0], [0], [1], [0, 0, 1, 1], [], []>} : vector<16x256xf32>, vector<256x128xf32>, vector<16x128xf32> -> vector<16x128xf32>
    %c256 = arith.constant 256 : index
    %c0_34 = arith.constant 0 : index
    %101 = vector.load %arg5[%c256, %c0_34] : memref<264x128xf32, #tpu.memory_space<vmem>>, vector<1x128xf32>
    %102 = vector.broadcast %101 : vector<1x128xf32> to vector<16x128xf32>
    %103 = arith.addf %100, %102 : vector<16x128xf32>
    %cst_35 = arith.constant 0.000000e+00 : f32
    %104 = vector.broadcast %cst_35 : f32 to vector<16x128xf32>
    %105 = arith.maximumf %103, %104 : vector<16x128xf32>
    %c0_36 = arith.constant 0 : index
    %c0_37 = arith.constant 0 : index
    %106 = vector.load %arg6[%c0_36, %c0_37] : memref<136x128xf32, #tpu.memory_space<vmem>>, vector<128x128xf32>
    %cst_38 = arith.constant dense<0.000000e+00> : vector<16x128xf32>
    %107 = tpu.matmul %105, %106, %cst_38 {dimension_numbers = #tpu.dot_dimension_numbers<[1], [0], [0], [1], [0, 0, 1, 1], [], []>} : vector<16x128xf32>, vector<128x128xf32>, vector<16x128xf32> -> vector<16x128xf32>
    %c128 = arith.constant 128 : index
    %c0_39 = arith.constant 0 : index
    %108 = vector.load %arg6[%c128, %c0_39] : memref<136x128xf32, #tpu.memory_space<vmem>>, vector<1x128xf32>
    %109 = vector.broadcast %108 : vector<1x128xf32> to vector<16x128xf32>
    %110 = arith.addf %107, %109 : vector<16x128xf32>
    %111 = math.tanh %110 : vector<16x128xf32>
    %c0_40 = arith.constant 0 : index
    %c0_41 = arith.constant 0 : index
    %112 = vector.load %arg7[%c0_40, %c0_41] : memref<16x128xf32, #tpu.memory_space<vmem>>, vector<16x128xf32>
    tpu.vector_store %arg7[%c0_40, %c0_41], %111 {strides = array<i32>} : memref<16x128xf32, #tpu.memory_space<vmem>>, vector<16x128xf32>,
    return
  }
}

</mosaic_0001>

<bundles_post_ra>
// kernel: tpu_custom_call.1
= control target key start
LH: loop header
LB: loop body
LE: loop exit
PB: predicated region body
PF: predicated region fallthrough
CT: control target
= control target key end

     0   :  { %12 = vsyncpa [#allocation3], 0  ;;  %s1420_s0 = inlined_call_operand.vmem [shape: f32[16,2], index: 0, kind: input, shape index: {}]   ;;  %s1421_s1 = inlined_call_operand.vmem [shape: f32[8,32], index: 1, kind: input, shape index: {}]   ;;  %s1422_s2 = inlined_call_operand.hbm [shape: f32[40,96], index: 2, kind: input, shape index: {}]   ;;  %s1423_s3 = inlined_call_operand.hbm [shape: f32[40,96], index: 3, kind: input, shape index: {}]   ;;  %s1424_s4 = inlined_call_operand.hbm [shape: f32[40,256], index: 4, kind: input, shape index: {}]   ;;  %s1425_s5 = inlined_call_operand.hbm [shape: f32[264,128], index: 5, kind: input, shape index: {}]   ;;  %s1426_s6 = inlined_call_operand.hbm [shape: f32[136,128], index: 6, kind: input, shape index: {}]   ;;  %s1427_s7 = inlined_call_operand.hbm [shape: f32[16,128], index: 7, kind: output, shape index: {}]  }
   0x1   :  { %13 = vsyncpa [#allocation6], 0 }
   0x2   :  { %14 = vsyncpa [#allocation9], 0 }
   0x3   :  { %15 = vsyncpa [#allocation4], 0  ;;  %s1216_s24 = smov [#allocation5]   ;;  %s1217_s26 = smov [#allocation8]  }
   0x4   :  { %s37_s25 = sshll.u32 %s1216_s24, 4  ;;  %s61_s27 = sshll.u32 %s1217_s26, 4  ;;  %s38_s25 = int_to_ptr.vmem [resolvable:$true] %s37_s25  ;;  %s1273_s27 = int_to_ptr.vmem [resolvable:$true] %s61_s27 }
   0x5   :  { %s1076_s30 = scalar_lea.hbm %s1423_s3, 640 }
   0x6   :  { %p1077_p0 = scmp.ne.s32.totalorder %s1423_s3, %s1076_s30  ;;  %p1080_p1 = scmp.lt.u32.totalorder %s1076_s30, %s1423_s3 }
   0x8   :  { %p1082_p2 = pnand %p1080_p1, %p1077_p0 }
   0xa   :  { %1085 = shalt.err (!%p1082_p2)
}
   0xb   :  { %s1086_s12 = scalar_lea.vmem %s38_s25, 640  ;;  %p1091_p4 = scmp.lt.s32.totalorder %s38_s25, %s38_s25 }
   0xc   :  { %p1087_p3 = scmp.ne.s32.totalorder %s38_s25, %s1086_s12  ;;  %p1092_p5 = scmp.lt.s32.totalorder %s1086_s12, %s1086_s12 }
   0xe   :  { %p1093_p6 = por %p1092_p5, %p1091_p4 }
  0x10   :  { %p1094_p7 = pnand %p1093_p6, %p1087_p3 }
  0x12   :  { %1097 = shalt.err (!%p1094_p7)
}
  0x13   :  { %s1218_s13 = smov 128   ;;  %s1219_s14 = smov 8  }
  0x14   :  { %43 = dma.hbm_to_vmem [thread:$0]  %s1423_s3, 640, %s38_s25, [#allocation6], %s1218_s13, %s1218_s13, %s1219_s14  }
  0x15   :  { %s1098_s19 = scalar_lea.hbm %s1425_s5, 4224 }
  0x16   :  { %p1099_p8 = scmp.ne.s32.totalorder %s1425_s5, %s1098_s19  ;;  %p1102_p9 = scmp.lt.u32.totalorder %s1098_s19, %s1425_s5 }
  0x18   :  { %p1104_p10 = pnand %p1102_p9, %p1099_p8 }
  0x1a   :  { %1107 = shalt.err (!%p1104_p10)
}
  0x1b   :  { %s1108_s24 = scalar_lea.vmem %s1273_s27, 4224  ;;  %p1113_p12 = scmp.lt.s32.totalorder %s1273_s27, %s1273_s27 }
  0x1c   :  { %p1109_p11 = scmp.ne.s32.totalorder %s1273_s27, %s1108_s24  ;;  %p1114_p13 = scmp.lt.s32.totalorder %s1108_s24, %s1108_s24 }
  0x1e   :  { %p1115_p0 = por %p1114_p13, %p1113_p12 }
  0x20   :  { %p1116_p1 = pnand %p1115_p0, %p1109_p11 }
  0x22   :  { %1119 = shalt.err (!%p1116_p1)
}
  0x23   :  { %67 = dma.hbm_to_vmem [thread:$0]  %s1425_s5, 4224, %s1273_s27, [#allocation9], %s1218_s13, %s1218_s13, %s1219_s14  }
  0x24   :  { %s1220_s26 = smov [#allocation2]   ;;  %s1221_s29 = smov [#allocation7]  }
  0x25   :  { %s25_s28 = sshll.u32 %s1220_s26, 4  ;;  %s49_s30 = sshll.u32 %s1221_s29, 4  ;;  %s26_s28 = int_to_ptr.vmem [resolvable:$true] %s25_s28  ;;  %s1310_s30 = int_to_ptr.vmem [resolvable:$true] %s49_s30 }
  0x26   :  { %s1120_s10 = scalar_lea.hbm %s1422_s2, 640 }
  0x27   :  { %p1121_p2 = scmp.ne.s32.totalorder %s1422_s2, %s1120_s10  ;;  %p1124_p3 = scmp.lt.u32.totalorder %s1120_s10, %s1422_s2 }
  0x29   :  { %p1126_p4 = pnand %p1124_p3, %p1121_p2 }
  0x2b   :  { %1129 = shalt.err (!%p1126_p4)
}
  0x2c   :  { %s1130_s5 = scalar_lea.vmem %s26_s28, 640  ;;  %p1135_p6 = scmp.lt.s32.totalorder %s26_s28, %s26_s28 }
  0x2d   :  { %p1131_p5 = scmp.ne.s32.totalorder %s26_s28, %s1130_s5  ;;  %p1136_p7 = scmp.lt.s32.totalorder %s1130_s5, %s1130_s5 }
  0x2f   :  { %p1137_p8 = por %p1136_p7, %p1135_p6 }
  0x31   :  { %p1138_p9 = pnand %p1137_p8, %p1131_p5 }
  0x33   :  { %1141 = shalt.err (!%p1138_p9)
}
  0x34   :  { %31 = dma.hbm_to_vmem [thread:$0]  %s1422_s2, 640, %s26_s28, [#allocation3], %s1218_s13, %s1218_s13, %s1219_s14  }
  0x35   :  { %s1142_s20 = scalar_lea.hbm %s1424_s4, 1280 }
  0x36   :  { %p1143_p10 = scmp.ne.s32.totalorder %s1424_s4, %s1142_s20  ;;  %p1146_p11 = scmp.lt.u32.totalorder %s1142_s20, %s1424_s4 }
  0x38   :  { %p1148_p12 = pnand %p1146_p11, %p1143_p10 }
  0x3a   :  { %1151 = shalt.err (!%p1148_p12)
}
  0x3b   :  { %s1152_s3 = scalar_lea.vmem %s1310_s30, 1280  ;;  %p1157_p0 = scmp.lt.s32.totalorder %s1310_s30, %s1310_s30 }
  0x3c   :  { %p1153_p13 = scmp.ne.s32.totalorder %s1310_s30, %s1152_s3  ;;  %p1158_p1 = scmp.lt.s32.totalorder %s1152_s3, %s1152_s3 }
  0x3e   :  { %p1159_p2 = por %p1158_p1, %p1157_p0 }
  0x40   :  { %p1160_p3 = pnand %p1159_p2, %p1153_p13 }
  0x42   :  { %1163 = shalt.err (!%p1160_p3)
}
  0x43   :  { %s1222_s2 = smov 256   ;;  %s1223_s25 = smov 16  }
  0x44   :  { %55 = dma.hbm_to_vmem [thread:$0]  %s1424_s4, 1280, %s1310_s30, [#allocation6], %s1222_s2, %s1222_s2, %s1223_s25  }
  0x45   :  { %s1224_s29 = smov [#allocation10]   ;;  %s1164_s11 = scalar_lea.hbm %s1426_s6, 2176 }
  0x46   :  { %s73_s8 = sshll.u32 %s1224_s29, 4  ;;  %p1165_p4 = scmp.ne.s32.totalorder %s1426_s6, %s1164_s11  ;;  %s74_s8 = int_to_ptr.vmem [resolvable:$true] %s73_s8 }
  0x47   :  { %p1168_p5 = scmp.lt.u32.totalorder %s1164_s11, %s1426_s6 }
  0x49   :  { %p1170_p6 = pnand %p1168_p5, %p1165_p4 }
  0x4b   :  { %1173 = shalt.err (!%p1170_p6)
}
  0x4c   :  { %s1174_s27 = scalar_lea.vmem %s74_s8, 2176  ;;  %p1179_p8 = scmp.lt.s32.totalorder %s74_s8, %s74_s8 }
  0x4d   :  { %p1175_p7 = scmp.ne.s32.totalorder %s74_s8, %s1174_s27  ;;  %p1180_p9 = scmp.lt.s32.totalorder %s1174_s27, %s1174_s27 }
  0x4f   :  { %p1181_p10 = por %p1180_p9, %p1179_p8 }
  0x51   :  { %p1182_p11 = pnand %p1181_p10, %p1175_p7 }
  0x53   :  { %1185 = shalt.err (!%p1182_p11)
}
  0x54   :  { %79 = dma.hbm_to_vmem [thread:$0]  %s1426_s6, 2176, %s74_s8, [#allocation9], %s1218_s13, %s1218_s13, %s1219_s14  }
  0x55   :  { %1208 = dma.done.wait [#allocation3], 640  }
  0x56   :  { %1209 = vsyncadd [#allocation3], 4294966656 }
  0x57   :  { %1210 = dma.done.wait [#allocation6], 1920  }
  0x58   :  { %1211 = vsyncadd [#allocation6], 4294965376 }
  0x59   :  { %1212 = dma.done.wait [#allocation9], 6400  }
  0x5a   :  { %1213 = vsyncadd [#allocation9], 4294960896  ;;  %v1225_v0 = vmov 0   ;;  %v1226_v1 = vmov 0.0|0.0   ;;  %vm1227_vm0 = vmmov 0   ;;  %v1228_v2 = vmov 0.0  }
  0x5b   :  { %1058 = vset.pattern.permute.xlu1 %v1225_v0  ;;  %1056 = vset.pattern.permute.xlu0 %v1225_v0  ;;  %v96_v3 = vld [vmem:[%s1420_s0 + $0x8] sm:$0xff]  ;;  %v95_v4 = vld [vmem:[%s1420_s0] sm:$0xff]  ;;  %v152_v8 = vld [vmem:[#allocation5 + $0x8] sm:$0xff]  ;;  %v1229_v17 = vmov 1   ;;  %vm160_vm1 = vcmask 261120   ;;  %s1231_s3 = smov 96  }
  0x5c   :  { %955 = vmatprep.subr.bf16.mxu1 %v1226_v1  ;;  %898 = vmatprep.mubr.msk.f32.mxu1 %vm1227_vm0, %v1228_v2  ;;  %v151_v5 = vld [vmem:[#allocation5] sm:$0xff]  ;;  %v101_v6 = vmul.f32 0.0055555557, %v96_v3  ;;  %v100_v7 = vmul.f32 0.0055555557, %v95_v4  ;;  %v153_v9 = vld [vmem:[#allocation5 + $0x10] sm:$0xff] }
  0x5d   :  { %v154_v10 = vld [vmem:[#allocation5 + $0x18] sm:$0xff]  ;;  %v956_v11 = vpack.c.bf16 %v152_v8, %v151_v5  ;;  %v119_v12 = vmul.f32 0.0025, %v96_v3  ;;  %v118_v13 = vmul.f32 0.0025, %v95_v4  ;;  %v147_v16 = vld [vmem:[#allocation2 + $0x8] sm:$0xff] }
  0x5e   :  { %109 = vperm.xlu1 %1058, %v101_v6   ;;  %104 = vperm.xlu0 %1056, %v100_v7   ;;  %v959_v14 = vpack.c.bf16 %v154_v10, %v153_v9  ;;  %v146_v15 = vld [vmem:[#allocation2] sm:$0xff]  ;;  %v148_v19 = vld [vmem:[#allocation2 + $0x10] sm:$0xff]  ;;  %v149_v20 = vld [vmem:[#allocation2 + $0x18] sm:$0xff]  ;;  %s1232_s2 = smov [#allocation11]  }
  0x5f   :  { %957 = vmatpush3.bf16.msra.mxu1 %v956_v11  ;;  %v947_v18 = vpack.c.bf16 %v147_v16, %v146_v15  ;;  %v951_v21 = vpack.c.bf16 %v149_v20, %v148_v19  ;;  %v793_v24 = vld [vmem:[%s1421_s1] ss:$0 sm:$0xff]  ;;  %v794_v25 = vld [vmem:[%s1421_s1 + $0x1] ss:$0 sm:$0xff]  ;;  %v795_v32 = vld [vmem:[%s1421_s1 + $0x2] ss:$0 sm:$0xff] }
  0x60   :  { %958 = vmatprep.subr.bf16.mxu1 %v1226_v1  ;;  %v799_v39 = vld [vmem:[#allocation5 + $0x20] ss:$0 sm:$0xff]  ;;  %s1230_s1 = smov 64   ;;  %v796_v43 = vld [vmem:[#allocation2 + $0x20] ss:$0 sm:$0xff]  ;;  %v449_v0 = vld [vmem:[#allocation7 + $0x8] sm:$0xff] }
  0x61   :  { %948 = vmatprep.subr.bf16.mxu0 %v947_v18  ;;  %v448_v3 = vld [vmem:[#allocation7] sm:$0xff]  ;;  %v450_v5 = vld [vmem:[#allocation7 + $0x10] sm:$0xff]  ;;  %v455_v15 = vld [vmem:[#allocation7 + $0x38] sm:$0xff]  ;;  %s779_s25 = sshll.u32 %s1232_s2, 4  ;;  %s780_s25 = int_to_ptr.vmem [resolvable:$true] %s779_s25 }
  0x62   :  { %1059 = vset.pattern.permute.xlu1 %v1229_v17  ;;  %1057 = vset.pattern.permute.xlu0 %v1229_v17  ;;  %v969_v6 = vpack.c.bf16 %v450_v5, %v448_v3  ;;  %v452_v17 = vld [vmem:[#allocation7 + $0x20] sm:$0xff]  ;;  %v573_v5 = vld [vmem:[#allocation8 + $0x68] sm:$0xff]  ;;  %s1186_s26 = scalar_lea.vmem %s780_s25, 256  ;;  %p1191_p13 = scmp.lt.s32.totalorder %s780_s25, %s780_s25 }
  0x63   :  { %127 = vperm.xlu1 %1059, %v119_v12   ;;  %122 = vperm.xlu0 %1057, %v118_v13   ;;  %p1187_p12 = scmp.ne.s32.totalorder %s780_s25, %s1186_s26  ;;  %p1192_p0 = scmp.lt.s32.totalorder %s1186_s26, %s1186_s26 }
  0x64   :  { %960 = vmatpush3.bf16.msra.mxu1 %v959_v14  ;;  %950 = vmatpush3.bf16.msra.mxu0 %v947_v18  ;;  %v454_v18 = vld [vmem:[#allocation7 + $0x30] sm:$0xff] }
  0x65   :  { %952 = vmatprep.subr.bf16.mxu0 %v951_v21  ;;  %v973_v19 = vpack.c.bf16 %v454_v18, %v452_v17  ;;  %p1193_p1 = por %p1192_p0, %p1191_p13 }
  0x67   :  { %899 = vmatmul.mubr.f32.vlgmr.msra.gmra.mrb[0].mxu1 %v1228_v2  ;;  %p1194_p2 = pnand %p1193_p1, %p1187_p12 }
  0x68   :  { %543 = vmatprep.mubr.f32.mxu1 %v1228_v2  ;;  %954 = vmatpush3.bf16.msra.mxu0 %v951_v21 }
  0x69   :  { %961 = vmatprep.subr.bf16.mxu0 %v1226_v1 }
  0xdd   :  { %v105_v22 = vpop.permute.xlu0 %104  ;;  %v110_v23 = vpop.permute.xlu1 %109 }
  0xde   :  { %v116_v28 = vmul.f32 %v793_v24, %v105_v22  ;;  %v117_v29 = vmul.f32 %v793_v24, %v110_v23 }
  0xe2   :  { %v128_v26 = vpop.permute.xlu1 %127  ;;  %v123_v27 = vpop.permute.xlu0 %122 }
  0xe3   :  { %v135_v30 = vmul.f32 %v794_v25, %v128_v26  ;;  %v134_v31 = vmul.f32 %v794_v25, %v123_v27  ;;  %v576_v27 = vld [vmem:[#allocation8 + $0x80] sm:$0xff] }
  0xe5   :  { %v137_v33 = vadd.f32 %v135_v30, %v117_v29  ;;  %v136_v34 = vadd.f32 %v134_v31, %v116_v28  ;;  %v577_v28 = vld [vmem:[#allocation8 + $0x88] sm:$0xff]  ;;  %v560_v29 = vld [vmem:[#allocation8] sm:$0xff] }
  0xe6   :  { %v975_v30 = vpack.c.bf16 %v577_v28, %v576_v27  ;;  %v561_v31 = vld [vmem:[#allocation8 + $0x8] sm:$0xff] }
  0xe7   :  { %v142_v35 = vadd.f32 %v795_v32, %v136_v34  ;;  %v143_v36 = vadd.f32 %v795_v32, %v137_v33  ;;  %v578_v32 = vld [vmem:[#allocation8 + $0x90] sm:$0xff]  ;;  %v579_v33 = vld [vmem:[#allocation8 + $0x98] sm:$0xff]  ;;  %v977_v34 = vpack.c.bf16 %v561_v31, %v560_v29 }
  0xe9   :  { %v144_v37 = vmax.f32 %v142_v35, 0.0  ;;  %v145_v38 = vmax.f32 %v143_v36, 0.0  ;;  %v979_v35 = vpack.c.bf16 %v579_v33, %v578_v32  ;;  %v562_v36 = vld [vmem:[#allocation8 + $0x10] sm:$0xff] }
  0xea   :  { %v675_v33 = vld [vmem:[#allocation10 + $0x8] sm:$0xff] }
  0xeb   :  { %887 = vmatprep.mubr.msk.f32.mxu0 %vm160_vm1, %v144_v37  ;;  %v563_v37 = vld [vmem:[#allocation8 + $0x18] sm:$0xff] }
  0xec   :  { %888 = vmatmul.mubr.msk.f32.vlgmr.msra.gmra.mrb[0].mxu0 %vm160_vm1, %v145_v38  ;;  %v580_v38 = vld [vmem:[#allocation8 + $0xa0] sm:$0xff] }
  0xed   :  { %963 = vmatpush3.bf16.msra.mxu0 %v956_v11  ;;  %909 = vmatprep.mubr.msk.f32.mxu0 %vm1227_vm0, %v1228_v2 }
  0xee   :  { %964 = vmatprep.subr.bf16.mxu0 %v1226_v1  ;;  %v451_v1 = vld [vmem:[#allocation7 + $0x18] sm:$0xff] }
  0xef   :  { %v967_v4 = vpack.c.bf16 %v451_v1, %v449_v0  ;;  %v589_v0 = vld [vmem:[#allocation8 + $0xe8] sm:$0xff] }
  0xf1   :  { %966 = vmatpush3.bf16.msra.mxu0 %v959_v14  ;;  %968 = vmatprep.subr.bf16.mxu1 %v967_v4  ;;  %v453_v14 = vld [vmem:[#allocation7 + $0x28] sm:$0xff]  ;;  %v572_v4 = vld [vmem:[#allocation8 + $0x60] sm:$0xff] }
  0xf2   :  { %970 = vmatpush1.bf16.msra.mxu1 %v969_v6  ;;  %v971_v16 = vpack.c.bf16 %v455_v15, %v453_v14  ;;  %976 = vmatprep.subr.bf16.mxu0 %v975_v30  ;;  %v1001_v6 = vpack.c.bf16 %v573_v5, %v572_v4 }
  0xf4   :  { %972 = vmatprep.subr.bf16.mxu1 %v971_v16 }
  0xf6   :  { %974 = vmatpush1.bf16.msra.mxu1 %v973_v19  ;;  %v459_v19 = vlaneseq }
 0x13a   :  { %v315_v40 = vpop.f32.mrb[0].mxu1 }
 0x13b   :  { %v316_v41 = vadd.f32 %v799_v39, %v315_v40  ;;  %v900_v42 = vpop.f32.mrb[1].mxu1  ;;  %v981_v40 = vpack.c.bf16 %v563_v37, %v562_v36  ;;  %v677_v36 = vld [vmem:[#allocation10 + $0x18] sm:$0xff] }
 0x13c   :  { %v564_v42 = vld [vmem:[#allocation8 + $0x20] sm:$0xff] }
 0x13d   :  { %327 = vrot.lane.b32.xlu1 %v316_v41, %s1230_s1 }
 0x1af   :  { %v328_v52 = vpop.permute.xlu1 %327 }
 0x1bf   :  { %v889_v44 = vpop.f32.mrb[0].mxu0 }
 0x1c0   :  { %v239_v45 = vadd.f32 %v889_v44, %v796_v43  ;;  %v233_v46 = vpop.f32.mrb[1].mxu0  ;;  %v582_v44 = vld [vmem:[#allocation8 + $0xb0] sm:$0xff] }
 0x1c1   :  { %v234_v47 = vadd.f32 %v796_v43, %v233_v46 }
 0x1c3   :  { %v319_v48 = vadd.f32 %v316_v41, %v234_v47 }
 0x1c5   :  { %v800_v49 = vmul.f32 -1.442695, %v319_v48  ;;  %v566_v48 = vld [vmem:[#allocation8 + $0x30] sm:$0xff] }
 0x1c7   :  { %1060 = vpow2.f32 %v800_v49  ;;  %v567_v49 = vld [vmem:[#allocation8 + $0x38] sm:$0xff] }
 0x1d1   :  { %v1061_v50 = vpop.eup %1060 }
 0x1d2   :  { %v323_v51 = vadd.f32 1.0, %v1061_v50  ;;  %v584_v50 = vld [vmem:[#allocation8 + $0xc0] sm:$0xff] }
 0x1d4   :  { %1062 = vrcp.f32 %v323_v51  ;;  %v585_v51 = vld [vmem:[#allocation8 + $0xc8] sm:$0xff] }
 0x1de   :  { %v1063_v53 = vpop.eup %1062 }
 0x1df   :  { %v330_v54 = vmul.f32 %v1063_v53, %v328_v52  ;;  %v337_v58 = vsub.f32 1.0, %v1063_v53  ;;  %v343_v60 = vmul.f32 0.0, %v1063_v53  ;;  %v989_v52 = vpack.c.bf16 %v567_v49, %v566_v48 }
 0x1e0   :  { %v991_v53 = vpack.c.bf16 %v585_v51, %v584_v50  ;;  %v805_v50 = vld [vmem:[#allocation8 + $0x100] ss:$0 sm:$0xff] }
 0x1e1   :  { %332 = vrot.lane.b32.xlu0 %v330_v54, %s1230_s1  ;;  %v568_v54 = vld [vmem:[#allocation8 + $0x40] sm:$0xff] }
 0x253   :  { %v333_v55 = vpop.permute.xlu0 %332 }
 0x254   :  { %v335_v56 = vadd.f32 %v333_v55, %v234_v47  ;;  %v569_v55 = vld [vmem:[#allocation8 + $0x48] sm:$0xff] }
 0x256   :  { %1064 = vtanh.f32 %v335_v56  ;;  %v586_v56 = vld [vmem:[#allocation8 + $0xd0] sm:$0xff] }
 0x260   :  { %v1065_v57 = vpop.eup %1064 }
 0x261   :  { %339 = vrot.lane.b32.xlu1 %v1065_v57, %s1231_s3  ;;  %v587_v57 = vld [vmem:[#allocation8 + $0xd8] sm:$0xff] }
 0x2d3   :  { %v340_v59 = vpop.permute.xlu1 %339 }
 0x2d4   :  { %v342_v61 = vmul.f32 %v340_v59, %v337_v58  ;;  %v993_v58 = vpack.c.bf16 %v569_v55, %v568_v54  ;;  %v995_v59 = vpack.c.bf16 %v587_v57, %v586_v56 }
 0x2d6   :  { %v1385_v62 = vadd.f32 %v343_v60, %v342_v61  ;;  %v570_v60 = vld [vmem:[#allocation8 + $0x50] sm:$0xff]  ;;  %v571_v61 = vld [vmem:[#allocation8 + $0x58] sm:$0xff] }
 0x2d7   :  { %v997_v1 = vpack.c.bf16 %v571_v61, %v570_v60  ;;  %v686_v61 = vld [vmem:[#allocation10 + $0x60] sm:$0xff] }
 0x2d8   :  { %346 = vrot.lane.b32.xlu0 %v1385_v62, %s1231_s3  ;;  %v446_v23 = vmax.f32 %v1385_v62, 0.0 }
 0x34a   :  { %v347_v63 = vpop.permute.xlu0 %346 }
 0x34b   :  { %910 = vmatmul.mubr.msk.f32.vlgmr.msra.gmra.mrb[2].mxu0 %vm160_vm1, %v347_v63  ;;  %v588_v63 = vld [vmem:[#allocation8 + $0xe0] sm:$0xff] }
 0x34c   :  { %978 = vmatpush3.bf16.msra.mxu0 %v977_v34  ;;  %v999_v3 = vpack.c.bf16 %v589_v0, %v588_v63  ;;  %v676_v34 = vld [vmem:[#allocation10 + $0x10] sm:$0xff]  ;;  %v687_v63 = vld [vmem:[#allocation10 + $0x68] sm:$0xff] }
 0x34d   :  { %980 = vmatprep.subr.bf16.mxu0 %v979_v35  ;;  %v1011_v37 = vpack.c.bf16 %v677_v36, %v676_v34  ;;  %v1031_v0 = vpack.c.bf16 %v687_v63, %v686_v61 }
 0x350   :  { %982 = vmatpush3.bf16.msra.mxu0 %v981_v40 }
 0x41e   :  { %v416_v7 = vpop.f32.mrb[2].mxu0 }
 0x41f   :  { %v417_v8 = vadd.f32 %v799_v39, %v416_v7  ;;  %v911_v9 = vpop.f32.mrb[3].mxu0  ;;  %v581_v39 = vld [vmem:[#allocation8 + $0xa8] sm:$0xff]  ;;  %v590_v7 = vld [vmem:[#allocation8 + $0xf0] sm:$0xff] }
 0x420   :  { %v983_v41 = vpack.c.bf16 %v581_v39, %v580_v38  ;;  %v678_v38 = vld [vmem:[#allocation10 + $0x20] sm:$0xff]  ;;  %v679_v39 = vld [vmem:[#allocation10 + $0x28] sm:$0xff] }
 0x421   :  { %428 = vrot.lane.b32.xlu1 %v417_v8, %s1230_s1  ;;  %v420_v10 = vadd.f32 %v417_v8, %v239_v45  ;;  %v591_v8 = vld [vmem:[#allocation8 + $0xf8] sm:$0xff]  ;;  %v1015_v40 = vpack.c.bf16 %v679_v39, %v678_v38 }
 0x422   :  { %984 = vmatprep.subr.bf16.mxu0 %v983_v41  ;;  %v1003_v9 = vpack.c.bf16 %v591_v8, %v590_v7  ;;  %v680_v41 = vld [vmem:[#allocation10 + $0x30] sm:$0xff] }
 0x423   :  { %v802_v11 = vmul.f32 -1.442695, %v420_v10  ;;  %v574_v10 = vld [vmem:[#allocation8 + $0x70] sm:$0xff] }
 0x425   :  { %1066 = vpow2.f32 %v802_v11  ;;  %v575_v11 = vld [vmem:[#allocation8 + $0x78] sm:$0xff] }
 0x42f   :  { %v1067_v12 = vpop.eup %1066 }
 0x430   :  { %v424_v13 = vadd.f32 1.0, %v1067_v12  ;;  %v1005_v12 = vpack.c.bf16 %v575_v11, %v574_v10  ;;  %v806_v10 = vld [vmem:[#allocation10 + $0x80] ss:$0 sm:$0xff] }
 0x432   :  { %1068 = vrcp.f32 %v424_v13 }
 0x43c   :  { %v1391_v20 = vpop.eup %1068 }
 0x43d   :  { %v438_v13 = vsub.f32 1.0, %v1391_v20  ;;  %v444_v15 = vmul.f32 %v1391_v20, %v1385_v62 }
 0x493   :  { %v429_v21 = vpop.permute.xlu1 %428 }
 0x494   :  { %v431_v22 = vmul.f32 %v1391_v20, %v429_v21  ;;  %v460_v21 = vshrl.u32 %v459_v19, 7  ;;  %v674_v20 = vld [vmem:[#allocation10] sm:$0xff] }
 0x495   :  { %v1007_v35 = vpack.c.bf16 %v675_v33, %v674_v20 }
 0x496   :  { %433 = vrot.lane.b32.xlu0 %v431_v22, %s1230_s1  ;;  %v461_v22 = vsub.s32 0, %v460_v21 }
 0x497   :  { %1008 = vmatprep.subr.bf16.mxu1 %v1007_v35 }
 0x49a   :  { %471 = vrot.lane.b32.xlu0 %v446_v23, %s1231_s3  ;;  %v457_v23 = vld [vmem:[#allocation7 + $0x40] ss:$8 sm:$0x3] }
 0x508   :  { %v434_v24 = vpop.permute.xlu0 %433 }
 0x509   :  { %v436_v25 = vadd.f32 %v434_v24, %v239_v45  ;;  %v583_v45 = vld [vmem:[#allocation8 + $0xb8] sm:$0xff]  ;;  %v465_v24 = vsub.s32 1, %v460_v21 }
 0x50a   :  { %v987_v47 = vpack.c.bf16 %v583_v45, %v582_v44  ;;  %v683_v44 = vld [vmem:[#allocation10 + $0x48] sm:$0xff] }
 0x50b   :  { %1070 = vtanh.f32 %v436_v25  ;;  %v462_v25 = vrot.slane %v457_v23, %v461_v22 }
 0x50c   :  { %v472_v26 = vpop.permute.xlu0 %471 }
 0x50d   :  { %803 = vmatmul.mubr.msk.f32.vlgmr.msra.gmra.mrb[2].mxu1 %vm160_vm1, %v472_v26  ;;  %v466_v26 = vrot.slane %v457_v23, %v465_v24 }
 0x50e   :  { %549 = vmatprep.mubr.f32.mxu1 %v1228_v2  ;;  %v565_v2 = vld [vmem:[#allocation8 + $0x28] sm:$0xff]  ;;  %1010 = vmatpush3.bf16.msra.mxu1 %v1007_v35 }
 0x50f   :  { %v985_v46 = vpack.c.bf16 %v565_v2, %v564_v42  ;;  %1012 = vmatprep.subr.bf16.mxu1 %v1011_v37  ;;  %v681_v42 = vld [vmem:[#allocation10 + $0x38] sm:$0xff] }
 0x510   :  { %v1019_v2 = vpack.c.bf16 %v681_v42, %v680_v41 }
 0x511   :  { %986 = vmatpush3.bf16.msra.mxu0 %v985_v46  ;;  %v684_v46 = vld [vmem:[#allocation10 + $0x50] sm:$0xff] }
 0x512   :  { %988 = vmatprep.subr.bf16.mxu0 %v987_v47  ;;  %1014 = vmatpush3.bf16.msra.mxu1 %v1011_v37  ;;  %v685_v47 = vld [vmem:[#allocation10 + $0x58] sm:$0xff] }
 0x513   :  { %1016 = vmatprep.subr.bf16.mxu1 %v1015_v40  ;;  %v1027_v48 = vpack.c.bf16 %v685_v47, %v684_v46 }
 0x515   :  { %v1071_v43 = vpop.eup %1070  ;;  %990 = vmatpush3.bf16.msra.mxu0 %v989_v52 }
 0x516   :  { %440 = vrot.lane.b32.xlu1 %v1071_v43, %s1231_s3  ;;  %992 = vmatprep.subr.bf16.mxu0 %v991_v53  ;;  %v682_v43 = vld [vmem:[#allocation10 + $0x40] sm:$0xff] }
 0x517   :  { %1018 = vmatpush3.bf16.msra.mxu1 %v1015_v40  ;;  %v1023_v45 = vpack.c.bf16 %v683_v44, %v682_v43 }
 0x518   :  { %1020 = vmatprep.subr.bf16.mxu1 %v1019_v2 }
 0x519   :  { %994 = vmatpush3.bf16.msra.mxu0 %v993_v58 }
 0x51a   :  { %996 = vmatprep.subr.bf16.mxu0 %v995_v59 }
 0x51b   :  { %1022 = vmatpush3.bf16.msra.mxu1 %v1019_v2 }
 0x51c   :  { %1024 = vmatprep.subr.bf16.mxu1 %v1023_v45 }
 0x51d   :  { %998 = vmatpush3.bf16.msra.mxu0 %v997_v1  ;;  %v688_v1 = vld [vmem:[#allocation10 + $0x70] sm:$0xff] }
 0x51e   :  { %1000 = vmatprep.subr.bf16.mxu0 %v999_v3  ;;  %v689_v3 = vld [vmem:[#allocation10 + $0x78] sm:$0xff] }
 0x51f   :  { %1026 = vmatpush3.bf16.msra.mxu1 %v1023_v45  ;;  %v1035_v4 = vpack.c.bf16 %v689_v3, %v688_v1 }
 0x520   :  { %1028 = vmatprep.subr.bf16.mxu1 %v1027_v48 }
 0x521   :  { %1002 = vmatpush3.bf16.msra.mxu0 %v1001_v6 }
 0x522   :  { %1004 = vmatprep.subr.bf16.mxu0 %v1003_v9 }
 0x523   :  { %1030 = vmatpush3.bf16.msra.mxu1 %v1027_v48 }
 0x524   :  { %1032 = vmatprep.subr.bf16.mxu1 %v1031_v0 }
 0x525   :  { %1006 = vmatpush3.bf16.msra.mxu0 %v1005_v12 }
 0x527   :  { %1034 = vmatpush3.bf16.msra.mxu1 %v1031_v0 }
 0x528   :  { %1036 = vmatprep.subr.bf16.mxu1 %v1035_v4 }
 0x52b   :  { %1038 = vmatpush3.bf16.msra.mxu1 %v1035_v4 }
 0x588   :  { %v441_v14 = vpop.permute.xlu1 %440 }
 0x589   :  { %v443_v16 = vmul.f32 %v441_v14, %v438_v13 }
 0x58b   :  { %v445_v17 = vadd.f32 %v444_v15, %v443_v16 }
 0x58d   :  { %v447_v18 = vmax.f32 %v445_v17, 0.0 }
 0x58f   :  { %473 = vrot.lane.b32.xlu1 %v447_v18, %s1231_s3 }
 0x5e0   :  { %v545_v27 = vpop.f32.mrb[2].mxu1 }
 0x5e1   :  { %v546_v28 = vadd.f32 %v545_v27, %v462_v25  ;;  %v547_v29 = vpop.f32.mrb[3].mxu1 }
 0x5e2   :  { %v548_v30 = vadd.f32 %v547_v29, %v466_v26 }
 0x5e3   :  { %v556_v32 = vmax.f32 %v546_v28, 0.0 }
 0x5e4   :  { %v557_v31 = vmax.f32 %v548_v30, 0.0 }
 0x5e6   :  { %661 = vmatprep.mubr.f32.mxu0 %v557_v31 }
 0x5e7   :  { %662 = vmatmul.mubr.f32.vlgmr.msra.gmra.mrb[4].mxu0 %v556_v32 }
 0x601   :  { %v474_v62 = vpop.permute.xlu1 %473 }
 0x602   :  { %804 = vmatmul.mubr.msk.f32.gmra.mrb[4].mxu1 %vm160_vm1, %v474_v62 }
 0x6ba   :  { %v855_v49 = vpop.f32.mrb[4].mxu0 }
 0x6bb   :  { %v856_v51 = vpop.f32.mrb[5].mxu0 }
 0x6bc   :  { %v857_v52 = vadd.f32 %v856_v51, %v855_v49 }
 0x6be   :  { %v664_v53 = vadd.f32 %v857_v52, %v805_v50 }
 0x6c0   :  { %v672_v54 = vmax.f32 %v664_v53, 0.0 }
 0x6c2   :  { %944 = vmatprep.mubr.f32.mxu1 %v672_v54 }
 0x6d5   :  { %v551_v55 = vpop.f32.mrb[4].mxu1 }
 0x6d6   :  { %v552_v56 = vadd.f32 %v551_v55, %v462_v25  ;;  %v553_v57 = vpop.f32.mrb[5].mxu1 }
 0x6d7   :  { %v554_v58 = vadd.f32 %v553_v57, %v466_v26 }
 0x6d8   :  { %v558_v60 = vmax.f32 %v552_v56, 0.0 }
 0x6d9   :  { %v559_v59 = vmax.f32 %v554_v58, 0.0 }
 0x6db   :  { %666 = vmatprep.mubr.f32.mxu0 %v559_v59 }
 0x6dc   :  { %667 = vmatmul.mubr.f32.gmra.mrb[6].mxu0 %v558_v60 }
 0x7af   :  { %v858_v5 = vpop.f32.mrb[6].mxu0 }
 0x7b0   :  { %v859_v6 = vpop.f32.mrb[7].mxu0 }
 0x7b1   :  { %v860_v7 = vadd.f32 %v859_v6, %v858_v5 }
 0x7b3   :  { %v669_v8 = vadd.f32 %v860_v7, %v805_v50 }
 0x7b5   :  { %v673_v9 = vmax.f32 %v669_v8, 0.0 }
 0x7b7   :  { %945 = vmatmul.mubr.f32.vlgmr.msra.gmra.mrb[6].mxu1 %v673_v9 }
 0x88a   :  { %v946_v11 = vpop.f32.mrb[6].mxu1 }
 0x88b   :  { %v767_v12 = vadd.f32 %v946_v11, %v806_v10  ;;  %v761_v13 = vpop.f32.mrb[7].mxu1 }
 0x88c   :  { %v762_v14 = vadd.f32 %v806_v10, %v761_v13 }
 0x88d   :  { %1072 = vtanh.f32 %v767_v12 }
 0x88e   :  { %1074 = vtanh.f32 %v762_v14 }
 0x897   :  { %v1073_v15 = vpop.eup %1072 }
 0x898   :  { %v1075_v16 = vpop.eup %1074  ;;  %773 = vst [vmem:[#allocation11 + $0x8] sm:$0xff] %v1073_v15 }
 0x899   :  { %772 = vst [vmem:[#allocation11] sm:$0xff] %v1075_v16 }
 0x89a   :  { %1197 = shalt.err (!%p1194_p2)
}
 0x89b   :  { %s1198_s8 = scalar_lea.hbm %s1427_s7, 256 }
 0x89c   :  { %p1199_p3 = scmp.ne.s32.totalorder %s1427_s7, %s1198_s8  ;;  %p1202_p4 = scmp.lt.u32.totalorder %s1198_s8, %s1427_s7 }
 0x89e   :  { %p1204_p5 = pnand %p1202_p4, %p1199_p3 }
 0x8a0   :  { %1207 = shalt.err (!%p1204_p5)
}
 0x8a1   :  { %785 = dma.vmem_to_hbm [thread:$0]  %s780_s25, 256, %s1427_s7, [#allocation4], %s1218_s13, %s1218_s13, %s1219_s14  }
 0x8a2   :  { %1214 = dma.done.wait [#allocation4], 256  }
 0x8a3   :  { %1215 = vsyncadd [#allocation4], 4294967040 }
 0x8a4   :  { %789 = vsyncpa [#allocation3], 1 }
 0x8a5   :  { %790 = vsyncpa [#allocation6], 1 }
 0x8a6   :  { %791 = vsyncpa [#allocation9], 1 }
 0x8a7   :  { %792 = vsyncpa [#allocation4], 1 }

</bundles_post_ra>
